<compile_context>
chip_gen: v7x
topology: tpu7x:2x2x1
jax: 0.10.0
libtpu: 0.0.40
codegen_flags: <defaults>
</compile_context>

<pallas_src>
import jax
import jax.numpy as jnp
from jax.experimental import pallas as pl
from jax.experimental.pallas import tpu as pltpu


def _decoder_kernel(x_ref, w1_ref, b1_ref, w2_ref, b2_ref, o_ref):
    # fc1 + ReLU  (MXU matmul with f32 accumulation; elementwise tail in f32)
    h = jnp.dot(x_ref[...], w1_ref[...], preferred_element_type=jnp.float32)
    h = jnp.maximum(h + b1_ref[...].astype(jnp.float32), 0.0)
    # fc2 + sigmoid
    y = jnp.dot(h.astype(w2_ref.dtype), w2_ref[...],
                preferred_element_type=jnp.float32)
    y = jax.nn.sigmoid(y + b2_ref[...].astype(jnp.float32))
    o_ref[...] = y.astype(o_ref.dtype)


def _round_up(a, m):
    return ((a + m - 1) // m) * m


def decoder_forward(x, w1, b1, w2, b2, *, batch_tile=1024, io_dtype=None):
    """x: (N, z_size). Returns (N, in_size).

    batch_tile: target rows per grid step (multiple of 8; big tiles keep the
        kernel near the HBM roofline).
    io_dtype: optional narrower dtype (e.g. jnp.bfloat16) for the DMA'd
        tensors x/W1/W2 and the output; accumulation stays f32.
    """
    n, z_size = x.shape
    h_size = w1.shape[1]
    in_size = w2.shape[1]
    out_dtype = x.dtype

    if io_dtype is not None:
        x = x.astype(io_dtype)
        w1 = w1.astype(io_dtype)
        w2 = w2.astype(io_dtype)
        out_dtype = io_dtype  # halves the dominant output store stream

    # Effective tile: as large as requested but no bigger than the (8-rounded)
    # batch, and always a multiple of 8 sublanes.
    tile = min(batch_tile, max(8, _round_up(n, 8)))
    tile = _round_up(tile, 8)

    # Ragged batches: zero-pad rows up to a tile multiple, slice afterwards.
    n_pad = _round_up(n, tile)
    if n_pad != n:
        x = jnp.pad(x, ((0, n_pad - n), (0, 0)))

    grid = (n_pad // tile,)
    out = pl.pallas_call(
        _decoder_kernel,
        out_shape=jax.ShapeDtypeStruct((n_pad, in_size), out_dtype),
        grid_spec=pltpu.PrefetchScalarGridSpec(
            num_scalar_prefetch=0,
            grid=grid,
            in_specs=[
                pl.BlockSpec((tile, z_size), lambda i: (i, 0)),    # x tile
                pl.BlockSpec((z_size, h_size), lambda i: (0, 0)),  # W1 (resident)
                pl.BlockSpec((1, h_size), lambda i: (0, 0)),       # b1
                pl.BlockSpec((h_size, in_size), lambda i: (0, 0)), # W2 (resident)
                pl.BlockSpec((1, in_size), lambda i: (0, 0)),      # b2
            ],
            out_specs=pl.BlockSpec((tile, in_size), lambda i: (i, 0)),
        ),
        compiler_params=pltpu.CompilerParams(
            dimension_semantics=("parallel",)),
    )(x, w1, b1, w2, b2)

    return out[:n]


def init_decoder_params(key, in_size, h_size, z_size, dtype=jnp.float32):
    """Mimics torch nn.Linear default init (U(-1/sqrt(fan_in), 1/sqrt(fan_in))).

    Weights returned already transposed to (fan_in, fan_out)."""
    k1, k2, k3, k4 = jax.random.split(key, 4)
    lim1 = 1.0 / (z_size ** 0.5)
    lim2 = 1.0 / (h_size ** 0.5)
    w1 = jax.random.uniform(k1, (z_size, h_size), dtype, -lim1, lim1)
    b1 = jax.random.uniform(k2, (1, h_size), dtype, -lim1, lim1)
    w2 = jax.random.uniform(k3, (h_size, in_size), dtype, -lim2, lim2)
    b2 = jax.random.uniform(k4, (1, in_size), dtype, -lim2, lim2)
    return w1, b1, w2, b2


def reference_forward(x, w1, b1, w2, b2):
    h = jnp.maximum(x @ w1 + b1, 0.0)
    return jax.nn.sigmoid(h @ w2 + b2)


if __name__ == "__main__":
    # Shapes consistent with the module: Decoder(in_size=64, h_size=32, z_size=16)
    in_size, h_size, z_size = 64, 32, 16

    key = jax.random.PRNGKey(0)
    kx1, kx2, kp = jax.random.split(key, 3)
    w1, b1, w2, b2 = init_decoder_params(kp, in_size, h_size, z_size)

    # Case 1: input as (batch, 1, z_size); emulate x.view(-1, z_size). f32 path.
    batch = 8
    x_raw = jax.random.normal(kx1, (batch, 1, z_size), dtype=jnp.float32)
    x = x_raw.reshape(-1, z_size)
    out = jax.block_until_ready(decoder_forward(x, w1, b1, w2, b2))
    ref = reference_forward(x, w1, b1, w2, b2)
    assert out.shape == (batch, in_size)
    assert jnp.allclose(out, ref, atol=1e-5, rtol=1e-5), "f32 mismatch"

    # Case 2: ragged batch (not a multiple of the tile) exercises padding path.
    batch2 = 37
    x2 = jax.random.normal(kx2, (batch2, z_size), dtype=jnp.float32)
    out2 = jax.block_until_ready(decoder_forward(x2, w1, b1, w2, b2))
    ref2 = reference_forward(x2, w1, b1, w2, b2)
    assert out2.shape == (batch2, in_size)
    assert jnp.allclose(out2, ref2, atol=1e-5, rtol=1e-5), "ragged mismatch"

    # Case 3: bf16 I/O path (v6e/v7x-friendly); looser tolerance for bf16 wires.
    out_bf16 = jax.block_until_ready(
        decoder_forward(x, w1, b1, w2, b2, io_dtype=jnp.bfloat16))
    assert out_bf16.shape == (batch, in_size)
    assert jnp.allclose(out_bf16.astype(jnp.float32), ref, atol=2e-2), "bf16 mismatch"

    print("KERNEL_OK")
</pallas_src>

<mosaic_0001>
module attributes {stable_mosaic.version = 11 : i64} {
  func.func @_decoder_kernel(%arg0: i32, %arg1: memref<8x16xf32, #tpu.memory_space<vmem>>, %arg2: memref<16x32xf32, #tpu.memory_space<vmem>>, %arg3: memref<1x32xf32, #tpu.memory_space<vmem>>, %arg4: memref<32x64xf32, #tpu.memory_space<vmem>>, %arg5: memref<1x64xf32, #tpu.memory_space<vmem>>, %arg6: memref<8x64xf32, #tpu.memory_space<vmem>>) attributes {dimension_semantics = [#tpu.dimension_semantics<parallel>], iteration_bounds = array<i64: 1>, scalar_prefetch = 0 : i64, scratch_operands = 0 : i64, tpu.core_type = #tpu.core_type<tc>, window_params = [{transform_indices = @transform_0, window_bounds = array<i64: 8, 16>}, {pipeline_mode = #tpu.pipeline_mode<synchronous>, transform_indices = @transform_1, window_bounds = array<i64: 16, 32>}, {pipeline_mode = #tpu.pipeline_mode<synchronous>, transform_indices = @transform_2, window_bounds = array<i64: 1, 32>}, {pipeline_mode = #tpu.pipeline_mode<synchronous>, transform_indices = @transform_3, window_bounds = array<i64: 32, 64>}, {pipeline_mode = #tpu.pipeline_mode<synchronous>, transform_indices = @transform_4, window_bounds = array<i64: 1, 64>}, {transform_indices = @transform_5, window_bounds = array<i64: 8, 64>}]} {
    %c0 = arith.constant 0 : index
    %c0_0 = arith.constant 0 : index
    %0 = vector.load %arg1[%c0, %c0_0] : memref<8x16xf32, #tpu.memory_space<vmem>>, vector<8x16xf32>
    %c0_1 = arith.constant 0 : index
    %c0_2 = arith.constant 0 : index
    %1 = vector.load %arg2[%c0_1, %c0_2] : memref<16x32xf32, #tpu.memory_space<vmem>>, vector<16x32xf32>
    %cst = arith.constant dense<0.000000e+00> : vector<8x32xf32>
    %2 = tpu.matmul %0, %1, %cst {dimension_numbers = #tpu.dot_dimension_numbers<[1], [0], [0], [1], [0, 0, 1, 1], [], []>} : vector<8x16xf32>, vector<16x32xf32>, vector<8x32xf32> -> vector<8x32xf32>
    %c0_3 = arith.constant 0 : index
    %c0_4 = arith.constant 0 : index
    %3 = vector.load %arg3[%c0_3, %c0_4] : memref<1x32xf32, #tpu.memory_space<vmem>>, vector<1x32xf32>
    %4 = vector.broadcast %3 : vector<1x32xf32> to vector<8x32xf32>
    %5 = arith.addf %2, %4 : vector<8x32xf32>
    %cst_5 = arith.constant 0.000000e+00 : f32
    %6 = vector.broadcast %cst_5 : f32 to vector<8x32xf32>
    %7 = arith.maximumf %5, %6 : vector<8x32xf32>
    %c0_6 = arith.constant 0 : index
    %c0_7 = arith.constant 0 : index
    %8 = vector.load %arg4[%c0_6, %c0_7] : memref<32x64xf32, #tpu.memory_space<vmem>>, vector<32x64xf32>
    %cst_8 = arith.constant dense<0.000000e+00> : vector<8x64xf32>
    %9 = tpu.matmul %7, %8, %cst_8 {dimension_numbers = #tpu.dot_dimension_numbers<[1], [0], [0], [1], [0, 0, 1, 1], [], []>} : vector<8x32xf32>, vector<32x64xf32>, vector<8x64xf32> -> vector<8x64xf32>
    %c0_9 = arith.constant 0 : index
    %c0_10 = arith.constant 0 : index
    %10 = vector.load %arg5[%c0_9, %c0_10] : memref<1x64xf32, #tpu.memory_space<vmem>>, vector<1x64xf32>
    %11 = vector.broadcast %10 : vector<1x64xf32> to vector<8x64xf32>
    %12 = arith.addf %9, %11 : vector<8x64xf32>
    %13 = arith.negf %12 : vector<8x64xf32>
    %14 = math.exp %13 : vector<8x64xf32>
    %cst_11 = arith.constant 1.000000e+00 : f32
    %15 = vector.broadcast %cst_11 : f32 to vector<8x64xf32>
    %16 = arith.addf %15, %14 : vector<8x64xf32>
    %17 = arith.divf %15, %16 : vector<8x64xf32>
    %c0_12 = arith.constant 0 : index
    %c0_13 = arith.constant 0 : index
    %18 = vector.load %arg6[%c0_12, %c0_13] : memref<8x64xf32, #tpu.memory_space<vmem>>, vector<8x64xf32>
    tpu.vector_store %arg6[%c0_12, %c0_13], %17 {strides = array<i32>} : memref<8x64xf32, #tpu.memory_space<vmem>>, vector<8x64xf32>,
    return
  }
  func.func @transform_0(%arg0: i32) -> (i32, i32) {
    %c0_i32 = arith.constant 0 : i32
    %c0_i32_0 = arith.constant 0 : i32
    return %arg0, %c0_i32 : i32, i32
  }
  func.func @transform_1(%arg0: i32) -> (i32, i32) {
    %c0_i32 = arith.constant 0 : i32
    %c0_i32_0 = arith.constant 0 : i32
    %c0_i32_1 = arith.constant 0 : i32
    return %c0_i32, %c0_i32_0 : i32, i32
  }
  func.func @transform_2(%arg0: i32) -> (i32, i32) {
    %c0_i32 = arith.constant 0 : i32
    %c0_i32_0 = arith.constant 0 : i32
    %c0_i32_1 = arith.constant 0 : i32
    return %c0_i32, %c0_i32_0 : i32, i32
  }
  func.func @transform_3(%arg0: i32) -> (i32, i32) {
    %c0_i32 = arith.constant 0 : i32
    %c0_i32_0 = arith.constant 0 : i32
    %c0_i32_1 = arith.constant 0 : i32
    return %c0_i32, %c0_i32_0 : i32, i32
  }
  func.func @transform_4(%arg0: i32) -> (i32, i32) {
    %c0_i32 = arith.constant 0 : i32
    %c0_i32_0 = arith.constant 0 : i32
    %c0_i32_1 = arith.constant 0 : i32
    return %c0_i32, %c0_i32_0 : i32, i32
  }
  func.func @transform_5(%arg0: i32) -> (i32, i32) {
    %c0_i32 = arith.constant 0 : i32
    %c0_i32_0 = arith.constant 0 : i32
    return %arg0, %c0_i32 : i32, i32
  }
}

</mosaic_0001>

<bundles_post_ra>
// kernel: tpu_custom_call.1
= control target key start
LH: loop header
LB: loop body
LE: loop exit
PB: predicated region body
PF: predicated region fallthrough
CT: control target
= control target key end

     0   :  { %10 = vsyncpa [#allocation3], 0  ;;  %s500_s0 = inlined_call_operand.hbm [shape: f32[8,16], index: 0, kind: input, shape index: {}]   ;;  %s501_s1 = inlined_call_operand.hbm [shape: f32[16,32], index: 1, kind: input, shape index: {}]   ;;  %s502_s2 = inlined_call_operand.vmem [shape: f32[1,32], index: 2, kind: input, shape index: {}]   ;;  %s503_s3 = inlined_call_operand.hbm [shape: f32[32,64], index: 3, kind: input, shape index: {}]   ;;  %s504_s4 = inlined_call_operand.vmem [shape: f32[1,64], index: 4, kind: input, shape index: {}]   ;;  %s505_s5 = inlined_call_operand.hbm [shape: f32[8,64], index: 5, kind: output, shape index: {}]  }
   0x1   :  { %11 = vsyncpa [#allocation6], 0 }
   0x2   :  { %12 = vsyncpa [#allocation4], 0  ;;  %s401_s18 = smov [#allocation5]   ;;  %s307_s22 = scalar_lea.hbm %s501_s1, 256 }
   0x3   :  { %s28_s19 = sshll.u32 %s401_s18, 4  ;;  %p308_p0 = scmp.ne.s32.totalorder %s501_s1, %s307_s22  ;;  %s29_s19 = int_to_ptr.vmem [resolvable:$true] %s28_s19 }
   0x4   :  { %p311_p1 = scmp.lt.u32.totalorder %s307_s22, %s501_s1 }
   0x6   :  { %p313_p2 = pnand %p311_p1, %p308_p0 }
   0x8   :  { %316 = shalt.err (!%p313_p2)
}
   0x9   :  { %s317_s27 = scalar_lea.vmem %s29_s19, 256  ;;  %p322_p4 = scmp.lt.s32.totalorder %s29_s19, %s29_s19 }
   0xa   :  { %p318_p3 = scmp.ne.s32.totalorder %s29_s19, %s317_s27  ;;  %p323_p5 = scmp.lt.s32.totalorder %s317_s27, %s317_s27 }
   0xc   :  { %p324_p6 = por %p323_p5, %p322_p4 }
   0xe   :  { %p325_p7 = pnand %p324_p6, %p318_p3 }
  0x10   :  { %328 = shalt.err (!%p325_p7)
}
  0x11   :  { %s402_s28 = smov 128   ;;  %s403_s29 = smov 8  }
  0x12   :  { %34 = dma.hbm_to_vmem [thread:$0]  %s501_s1, 256, %s29_s19, [#allocation6], %s402_s28, %s402_s28, %s403_s29  }
  0x13   :  { %s404_s7 = smov [#allocation2]   ;;  %s405_s9 = smov [#allocation7]  }
  0x14   :  { %s19_s8 = sshll.u32 %s404_s7, 4  ;;  %s42_s10 = sshll.u32 %s405_s9, 4  ;;  %s20_s8 = int_to_ptr.vmem [resolvable:$true] %s19_s8  ;;  %s43_s10 = int_to_ptr.vmem [resolvable:$true] %s42_s10 }
  0x15   :  { %s329_s13 = scalar_lea.hbm %s500_s0, 128 }
  0x16   :  { %p330_p8 = scmp.ne.s32.totalorder %s500_s0, %s329_s13  ;;  %p333_p9 = scmp.lt.u32.totalorder %s329_s13, %s500_s0 }
  0x18   :  { %p335_p10 = pnand %p333_p9, %p330_p8 }
  0x1a   :  { %338 = shalt.err (!%p335_p10)
}
  0x1b   :  { %s339_s1 = scalar_lea.vmem %s20_s8, 128  ;;  %p344_p12 = scmp.lt.s32.totalorder %s20_s8, %s20_s8 }
  0x1c   :  { %p340_p11 = scmp.ne.s32.totalorder %s20_s8, %s339_s1  ;;  %p345_p13 = scmp.lt.s32.totalorder %s339_s1, %s339_s1 }
  0x1e   :  { %p346_p0 = por %p345_p13, %p344_p12 }
  0x20   :  { %p347_p1 = pnand %p346_p0, %p340_p11 }
  0x22   :  { %350 = shalt.err (!%p347_p1)
}
  0x23   :  { %22 = dma.hbm_to_vmem [thread:$0]  %s500_s0, 128, %s20_s8, [#allocation3]  }
  0x24   :  { %s351_s22 = scalar_lea.hbm %s503_s3, 512 }
  0x25   :  { %p352_p2 = scmp.ne.s32.totalorder %s503_s3, %s351_s22  ;;  %p355_p3 = scmp.lt.u32.totalorder %s351_s22, %s503_s3 }
  0x27   :  { %p357_p4 = pnand %p355_p3, %p352_p2 }
  0x29   :  { %360 = shalt.err (!%p357_p4)
}
  0x2a   :  { %s361_s27 = scalar_lea.vmem %s43_s10, 512  ;;  %p366_p6 = scmp.lt.s32.totalorder %s43_s10, %s43_s10 }
  0x2b   :  { %p362_p5 = scmp.ne.s32.totalorder %s43_s10, %s361_s27  ;;  %p367_p7 = scmp.lt.s32.totalorder %s361_s27, %s361_s27 }
  0x2d   :  { %p368_p8 = por %p367_p7, %p366_p6 }
  0x2f   :  { %p369_p9 = pnand %p368_p8, %p362_p5 }
  0x31   :  { %372 = shalt.err (!%p369_p9)
}
  0x32   :  { %48 = dma.hbm_to_vmem [thread:$0]  %s503_s3, 512, %s43_s10, [#allocation6], %s402_s28, %s402_s28, %s403_s29  }
  0x33   :  { %395 = dma.done.wait [#allocation3], 128  }
  0x34   :  { %396 = vsyncadd [#allocation3], 4294967168 }
  0x35   :  { %397 = dma.done.wait [#allocation6], 768  }
  0x36   :  { %398 = vsyncadd [#allocation6], 4294966528  ;;  %v406_v0 = vmov 0.0|0.0   ;;  %vm407_vm0 = vmmov 0   ;;  %v408_v1 = vmov 0.0   ;;  %v61_v2 = vld [vmem:[#allocation5] sm:$0xff] }
  0x37   :  { %285 = vmatprep.subr.bf16.mxu0 %v406_v0  ;;  %271 = vmatprep.mubr.msk.f32.mxu0 %vm407_vm0, %v408_v1  ;;  %v62_v3 = vld [vmem:[#allocation5 + $0x8] sm:$0xff]  ;;  %v145_v5 = vld [vmem:[#allocation7] sm:$0xff]  ;;  %v146_v6 = vld [vmem:[#allocation7 + $0x8] sm:$0xff]  ;;  %vm70_vm1 = vcmask 130048   ;;  %vm156_vm2 = vcmask 261120   ;;  %s409_s7 = smov [#allocation8]  }
  0x38   :  { %288 = vmatprep.subr.bf16.mxu1 %v406_v0  ;;  %282 = vmatprep.mubr.msk.f32.mxu1 %vm407_vm0, %v408_v1  ;;  %v286_v4 = vpack.c.bf16 %v62_v3, %v61_v2  ;;  %v289_v7 = vpack.c.bf16 %v146_v6, %v145_v5  ;;  %v60_v8 = vld [vmem:[#allocation2] sm:$0xff]  ;;  %v147_v9 = vld [vmem:[#allocation7 + $0x10] sm:$0xff]  ;;  %v148_v10 = vld [vmem:[#allocation7 + $0x18] sm:$0xff]  ;;  %vm236_vm3 = vcmask 523264  }
  0x39   :  { %v292_v11 = vpack.c.bf16 %v148_v10, %v147_v9  ;;  %v254_v12 = vld [vmem:[%s502_s2] ss:$0 sm:$0xff]  ;;  %s244_s2 = sshll.u32 %s409_s7, 4  ;;  %s245_s2 = int_to_ptr.vmem [resolvable:$true] %s244_s2 }
  0x3a   :  { %287 = vmatpush3.bf16.msra.mxu0 %v286_v4  ;;  %290 = vmatpush3.bf16.msra.mxu1 %v289_v7  ;;  %v256_v17 = vld [vmem:[%s504_s4] ss:$0 sm:$0xff]  ;;  %s373_s8 = scalar_lea.vmem %s245_s2, 128  ;;  %p378_p11 = scmp.lt.s32.totalorder %s245_s2, %s245_s2 }
  0x3b   :  { %291 = vmatprep.subr.bf16.mxu1 %v406_v0  ;;  %p374_p10 = scmp.ne.s32.totalorder %s245_s2, %s373_s8  ;;  %p379_p12 = scmp.lt.s32.totalorder %s373_s8, %s373_s8 }
  0x3d   :  { %272 = vmatmul.mubr.msk.f32.vlgmr.msra.gmra.mrb[0].mxu0 %vm70_vm1, %v60_v8  ;;  %p380_p13 = por %p379_p12, %p378_p11 }
  0x3e   :  { %293 = vmatpush3.bf16.msra.mxu1 %v292_v11 }
  0x3f   :  { %p381_p0 = pnand %p380_p13, %p374_p10 }
 0x110   :  { %v140_v13 = vpop.f32.mrb[0].mxu0 }
 0x111   :  { %v141_v14 = vadd.f32 %v254_v12, %v140_v13  ;;  %v273_v15 = vpop.f32.mrb[1].mxu0 }
 0x113   :  { %v144_v16 = vmax.f32 %v141_v14, 0.0 }
 0x115   :  { %283 = vmatmul.mubr.msk.f32.vlgmr.msra.gmra.mrb[0].mxu1 %vm156_vm2, %v144_v16 }
 0x1e8   :  { %v226_v18 = vpop.f32.mrb[0].mxu1 }
 0x1e9   :  { %v227_v19 = vadd.f32 %v256_v17, %v226_v18  ;;  %v284_v20 = vpop.f32.mrb[1].mxu1 }
 0x1eb   :  { %v258_v21 = vmul.f32 -1.442695, %v227_v19 }
 0x1ed   :  { %303 = vpow2.f32 %v258_v21 }
 0x1f7   :  { %v304_v22 = vpop.eup %303 }
 0x1f8   :  { %v233_v23 = vadd.f32 1.0, %v304_v22 }
 0x1fa   :  { %305 = vrcp.f32 %v233_v23 }
 0x204   :  { %v306_v24 = vpop.eup %305 }
 0x205   :  { %237 = vst.msk [vmem:[#allocation8] sm:$0xff] %vm236_vm3, %v306_v24 }
 0x206   :  { %384 = shalt.err (!%p381_p0)
}
 0x207   :  { %s385_s10 = scalar_lea.hbm %s505_s5, 128 }
 0x208   :  { %p386_p1 = scmp.ne.s32.totalorder %s505_s5, %s385_s10  ;;  %p389_p2 = scmp.lt.u32.totalorder %s385_s10, %s505_s5 }
 0x20a   :  { %p391_p3 = pnand %p389_p2, %p386_p1 }
 0x20c   :  { %394 = shalt.err (!%p391_p3)
}
 0x20d   :  { %247 = dma.vmem_to_hbm [thread:$0]  %s245_s2, 128, %s505_s5, [#allocation4]  }
 0x20e   :  { %399 = dma.done.wait [#allocation4], 128  }
 0x20f   :  { %400 = vsyncadd [#allocation4], 4294967168 }
 0x210   :  { %251 = vsyncpa [#allocation3], 1 }
 0x211   :  { %252 = vsyncpa [#allocation6], 1 }
 0x212   :  { %253 = vsyncpa [#allocation4], 1 }

</bundles_post_ra>
